<compile_context>
chip_gen: v7x
topology: tpu7x:2x2x1
jax: 0.10.0
libtpu: 0.0.40
codegen_flags: <defaults>
</compile_context>

<pallas_src>
import jax
import jax.numpy as jnp
from jax.experimental import pallas as pl
from jax.experimental.pallas import tpu as pltpu


def _round_up(x, m):
    return ((x + m - 1) // m) * m


def _fusion_kernel(x2_ref, x3_ref, w2d_ref, b2d_ref, w3d_ref, b3d_ref,
                   wf2_ref, wf3_ref, bf_ref, o_ref):
    """x2_ref: [TN, C2] bf16, x3_ref: [TN, C3] bf16 -> o_ref: [TN, OUT].

    Weights/biases are tiny, resident (constant index_map) and kept in f32;
    all matmuls accumulate in f32.
    """
    x2 = x2_ref[...].astype(jnp.float32)
    x3 = x3_ref[...].astype(jnp.float32)

    h2 = jnp.dot(x2, w2d_ref[...], preferred_element_type=jnp.float32)
    h2 = jnp.maximum(h2 + b2d_ref[...], 0.0)          # folded Conv2d+BN2d+ReLU

    h3 = jnp.dot(x3, w3d_ref[...], preferred_element_type=jnp.float32)
    h3 = jnp.maximum(h3 + b3d_ref[...], 0.0)          # folded Conv1d+BN1d+ReLU

    # fusion Linear split into the two halves of concat([h2, h3]) @ W^T
    y = (jnp.dot(h2, wf2_ref[...], preferred_element_type=jnp.float32)
         + jnp.dot(h3, wf3_ref[...], preferred_element_type=jnp.float32)
         + bf_ref[...])
    o_ref[...] = jnp.maximum(y, 0.0).astype(o_ref.dtype)


def _fold_bn(w, b, gamma, beta, mean, var, eps=1e-5):
    """Fold eval-mode BatchNorm into a preceding 1x1 conv / linear.

    w: [C_in, C_out], b: [C_out]; BN params are per output channel [C_out].
    """
    scale = gamma / jnp.sqrt(var + eps)
    return w * scale[None, :], (b - mean) * scale + beta
    # TODO(synk): training-mode BN (batch statistics) is not covered; this is
    # inference parity only.


def init_params(key, c2, c3, out):
    """Deterministic synthetic parameters matching the nn.Module shapes."""
    ks = jax.random.split(key, 10)
    return {
        # nn.Conv2d(c2, out, 1): weight [out, c2, 1, 1] (stored [out, c2]), bias [out]
        "conv2d_w": jax.random.normal(ks[0], (out, c2), jnp.float32) * 0.1,
        "conv2d_b": jax.random.normal(ks[1], (out,), jnp.float32) * 0.1,
        "bn2d_gamma": 1.0 + 0.1 * jax.random.normal(ks[2], (out,), jnp.float32),
        "bn2d_beta": 0.1 * jax.random.normal(ks[3], (out,), jnp.float32),
        "bn2d_mean": 0.05 * jax.random.normal(ks[4], (out,), jnp.float32),
        "bn2d_var": 1.0 + 0.1 * jax.random.uniform(ks[5], (out,), jnp.float32),
        # nn.Conv1d(c3, out, 1): weight [out, c3, 1] (stored [out, c3]), bias [out]
        "conv1d_w": jax.random.normal(ks[6], (out, c3), jnp.float32) * 0.1,
        "conv1d_b": jax.random.normal(ks[7], (out,), jnp.float32) * 0.1,
        "bn1d_gamma": jnp.ones((out,), jnp.float32),
        "bn1d_beta": jnp.zeros((out,), jnp.float32),
        "bn1d_mean": jnp.zeros((out,), jnp.float32),
        "bn1d_var": jnp.ones((out,), jnp.float32),
        # nn.Linear(2*out, out): weight [out, 2*out], bias [out]
        "fc_w": jax.random.normal(ks[8], (out, 2 * out), jnp.float32) * 0.1,
        "fc_b": jax.random.normal(ks[9], (out,), jnp.float32) * 0.1,
    }


def feature_fusion_forward(feat2d, feat3d, proj_indices, params, *,
                           tn=4096, compute_dtype=jnp.bfloat16,
                           out_dtype=jnp.bfloat16):
    """feat2d: [B, C2, H, W] (NCHW), feat3d: [N, C3],
       proj_indices: [N, 2] or [N, 3] int (x, y[, batch]) -> returns [N, OUT].
    """
    B, C2, H, W = feat2d.shape
    N, C3 = feat3d.shape
    OUT = params["fc_b"].shape[0]

    # ---- indexing glue: mirror the PyTorch module's formula verbatim --------
    # (the module computes linear_idx = y + x*H against its row-major (H,W)
    #  flatten; we replicate that exact convention, including the clamps)
    pi = proj_indices.astype(jnp.int32)
    x_idx = jnp.clip(pi[:, 0], 0, W - 1)
    y_idx = jnp.clip(pi[:, 1], 0, H - 1)
    linear_idx = jnp.clip(y_idx + x_idx * H, 0, H * W - 1)
    batch_idx = pi[:, 2] if pi.shape[1] > 2 else jnp.zeros((N,), jnp.int32)

    # ---- tile sizing: large point tiles, multiple of 16 (bf16 sublanes) -----
    tn16 = max(16, (tn // 16) * 16)
    tn_eff = min(tn16, _round_up(N, 16))
    Np = _round_up(N, tn_eff)
    pad_n = Np - N

    # ---- gather RAW 2D pixels (no full-map transpose pass, no conv yet) -----
    # Advanced indexing on the [B, C2, H*W] view touches only N*C2 elements;
    # the folded 1x1 conv + BN + ReLU is applied per point inside the kernel,
    # which is mathematically identical to the module's conv-then-gather order.
    feat2d_flat = feat2d.reshape(B, C2, H * W)
    f2d_g = feat2d_flat[batch_idx, :, linear_idx]                  # [N, C2]

    x2 = jnp.pad(f2d_g, ((0, pad_n), (0, 0))).astype(compute_dtype)   # [Np, C2]
    x3 = jnp.pad(feat3d, ((0, pad_n), (0, 0))).astype(compute_dtype)  # [Np, C3]
    # (padded rows produce relu(bias) garbage that is sliced off below)

    # ---- fold Conv+BN (eval mode); keep the tiny weights/biases in f32 ------
    w2d, b2d = _fold_bn(params["conv2d_w"].T, params["conv2d_b"],
                        params["bn2d_gamma"], params["bn2d_beta"],
                        params["bn2d_mean"], params["bn2d_var"])
    w3d, b3d = _fold_bn(params["conv1d_w"].T, params["conv1d_b"],
                        params["bn1d_gamma"], params["bn1d_beta"],
                        params["bn1d_mean"], params["bn1d_var"])
    wf = params["fc_w"].T                                          # [2*OUT, OUT]
    wf2, wf3 = wf[:OUT, :], wf[OUT:, :]
    b2d = b2d.reshape(1, OUT)
    b3d = b3d.reshape(1, OUT)
    bf = params["fc_b"].reshape(1, OUT)

    grid = (Np // tn_eff,)
    pts = lambda c: pl.BlockSpec((tn_eff, c), lambda i: (i, 0))    # streamed
    const = lambda r, c: pl.BlockSpec((r, c), lambda i: (0, 0))    # resident

    out = pl.pallas_call(
        _fusion_kernel,
        out_shape=jax.ShapeDtypeStruct((Np, OUT), out_dtype),
        grid_spec=pltpu.PrefetchScalarGridSpec(
            num_scalar_prefetch=0,
            grid=grid,
            in_specs=[
                pts(C2),            # gathered 2D pixel rows  [Np, C2] bf16
                pts(C3),            # 3D point features       [Np, C3] bf16
                const(C2, OUT),     # W2d (folded conv2d+bn2d) f32
                const(1, OUT),      # b2d
                const(C3, OUT),     # W3d (folded conv1d+bn1d) f32
                const(1, OUT),      # b3d
                const(OUT, OUT),    # Wf top half (applies to h2)
                const(OUT, OUT),    # Wf bottom half (applies to h3)
                const(1, OUT),      # bf
            ],
            out_specs=pts(OUT),     # [Np, OUT] bf16, unpadded channel axis
        ),
        compiler_params=pltpu.CompilerParams(
            dimension_semantics=("parallel",)),   # shards over N on v7x cores
    )(x2, x3, w2d, b2d, w3d, b3d, wf2, wf3, bf)

    return out[:N]   # only trims the N padding; OUT axis is already exact


def _reference(feat2d, feat3d, proj_indices, params, eps=1e-5):
    """Pure-JAX f32 reference mirroring the PyTorch forward (BN in eval mode)."""
    B, C2, H, W = feat2d.shape
    N, C3 = feat3d.shape
    OUT = params["fc_b"].shape[0]

    def bn(x, gamma, beta, mean, var, axis):
        shape = [1] * x.ndim
        shape[axis] = -1
        rs = lambda p: p.reshape(shape)
        return (x - rs(mean)) / jnp.sqrt(rs(var) + eps) * rs(gamma) + rs(beta)

    # conv_2d (1x1) + BN2d + ReLU over the full map, then gather (PyTorch order)
    z = (jnp.einsum("bchw,oc->bohw", feat2d, params["conv2d_w"])
         + params["conv2d_b"][None, :, None, None])
    z = jax.nn.relu(bn(z, params["bn2d_gamma"], params["bn2d_beta"],
                       params["bn2d_mean"], params["bn2d_var"], axis=1))
    feat2d_flat = z.reshape(B, OUT, H * W)

    pi = proj_indices.astype(jnp.int32)
    x_idx = jnp.clip(pi[:, 0], 0, W - 1)
    y_idx = jnp.clip(pi[:, 1], 0, H - 1)
    lin = jnp.clip(y_idx + x_idx * H, 0, H * W - 1)
    b_idx = pi[:, 2] if pi.shape[1] > 2 else jnp.zeros((N,), jnp.int32)
    f2d_mapped = feat2d_flat[b_idx, :, lin]                        # [N, OUT]

    # conv_3d (Conv1d k=1) + BN1d + ReLU
    y = feat3d @ params["conv1d_w"].T + params["conv1d_b"]
    y = jax.nn.relu(bn(y, params["bn1d_gamma"], params["bn1d_beta"],
                       params["bn1d_mean"], params["bn1d_var"], axis=1))

    fused = jnp.concatenate([f2d_mapped, y], axis=1)
    return jax.nn.relu(fused @ params["fc_w"].T + params["fc_b"])


if __name__ == "__main__":
    key = jax.random.PRNGKey(0)
    k_f2d, k_f3d, k_px, k_py, k_pb, k_params = jax.random.split(key, 6)

    B, C2, C3, OUT, H, W, N = 2, 4, 8, 16, 16, 16, 32

    feat2d = jax.random.normal(k_f2d, (B, C2, H, W), jnp.float32)
    feat3d = jax.random.normal(k_f3d, (N, C3), jnp.float32)
    proj_indices = jnp.stack(
        [jax.random.randint(k_px, (N,), 0, W),
         jax.random.randint(k_py, (N,), 0, H),
         jax.random.randint(k_pb, (N,), 0, B)], axis=1).astype(jnp.int32)

    params = init_params(k_params, C2, C3, OUT)

    out = feature_fusion_forward(feat2d, feat3d, proj_indices, params)
    out = jax.block_until_ready(out)

    ref = _reference(feat2d, feat3d, proj_indices, params)
    assert out.shape == (N, OUT), out.shape
    max_err = float(jnp.max(jnp.abs(out.astype(jnp.float32) - ref)))
    # activations are streamed bf16 in AND out (weights/accum stay f32), so the
    # tolerance vs. the pure-f32 reference is loosened accordingly.
    assert max_err < 3e-2, max_err

    print("KERNEL_OK")
</pallas_src>

<mosaic_0001>
module attributes {stable_mosaic.version = 11 : i64} {
  func.func @_fusion_kernel(%arg0: i32, %arg1: memref<32x4xbf16, #tpu.memory_space<vmem>>, %arg2: memref<32x8xbf16, #tpu.memory_space<vmem>>, %arg3: memref<4x16xf32, #tpu.memory_space<vmem>>, %arg4: memref<1x16xf32, #tpu.memory_space<vmem>>, %arg5: memref<8x16xf32, #tpu.memory_space<vmem>>, %arg6: memref<1x16xf32, #tpu.memory_space<vmem>>, %arg7: memref<16x16xf32, #tpu.memory_space<vmem>>, %arg8: memref<16x16xf32, #tpu.memory_space<vmem>>, %arg9: memref<1x16xf32, #tpu.memory_space<vmem>>, %arg10: memref<32x16xbf16, #tpu.memory_space<vmem>>) attributes {dimension_semantics = [#tpu.dimension_semantics<parallel>], iteration_bounds = array<i64: 1>, scalar_prefetch = 0 : i64, scratch_operands = 0 : i64, tpu.core_type = #tpu.core_type<tc>, window_params = [{transform_indices = @transform_0, window_bounds = array<i64: 32, 4>}, {transform_indices = @transform_1, window_bounds = array<i64: 32, 8>}, {pipeline_mode = #tpu.pipeline_mode<synchronous>, transform_indices = @transform_2, window_bounds = array<i64: 4, 16>}, {pipeline_mode = #tpu.pipeline_mode<synchronous>, transform_indices = @transform_3, window_bounds = array<i64: 1, 16>}, {pipeline_mode = #tpu.pipeline_mode<synchronous>, transform_indices = @transform_4, window_bounds = array<i64: 8, 16>}, {pipeline_mode = #tpu.pipeline_mode<synchronous>, transform_indices = @transform_5, window_bounds = array<i64: 1, 16>}, {pipeline_mode = #tpu.pipeline_mode<synchronous>, transform_indices = @transform_6, window_bounds = array<i64: 16, 16>}, {pipeline_mode = #tpu.pipeline_mode<synchronous>, transform_indices = @transform_7, window_bounds = array<i64: 16, 16>}, {pipeline_mode = #tpu.pipeline_mode<synchronous>, transform_indices = @transform_8, window_bounds = array<i64: 1, 16>}, {transform_indices = @transform_9, window_bounds = array<i64: 32, 16>}]} {
    %c0 = arith.constant 0 : index
    %c0_0 = arith.constant 0 : index
    %0 = vector.load %arg1[%c0, %c0_0] : memref<32x4xbf16, #tpu.memory_space<vmem>>, vector<32x4xbf16>
    %1 = arith.extf %0 : vector<32x4xbf16> to vector<32x4xf32>
    %c0_1 = arith.constant 0 : index
    %c0_2 = arith.constant 0 : index
    %2 = vector.load %arg2[%c0_1, %c0_2] : memref<32x8xbf16, #tpu.memory_space<vmem>>, vector<32x8xbf16>
    %3 = arith.extf %2 : vector<32x8xbf16> to vector<32x8xf32>
    %c0_3 = arith.constant 0 : index
    %c0_4 = arith.constant 0 : index
    %4 = vector.load %arg3[%c0_3, %c0_4] : memref<4x16xf32, #tpu.memory_space<vmem>>, vector<4x16xf32>
    %cst = arith.constant dense<0.000000e+00> : vector<32x16xf32>
    %5 = tpu.matmul %1, %4, %cst {dimension_numbers = #tpu.dot_dimension_numbers<[1], [0], [0], [1], [0, 0, 1, 1], [], []>} : vector<32x4xf32>, vector<4x16xf32>, vector<32x16xf32> -> vector<32x16xf32>
    %c0_5 = arith.constant 0 : index
    %c0_6 = arith.constant 0 : index
    %6 = vector.load %arg4[%c0_5, %c0_6] : memref<1x16xf32, #tpu.memory_space<vmem>>, vector<1x16xf32>
    %7 = vector.broadcast %6 : vector<1x16xf32> to vector<32x16xf32>
    %8 = arith.addf %5, %7 : vector<32x16xf32>
    %cst_7 = arith.constant 0.000000e+00 : f32
    %9 = vector.broadcast %cst_7 : f32 to vector<32x16xf32>
    %10 = arith.maximumf %8, %9 : vector<32x16xf32>
    %c0_8 = arith.constant 0 : index
    %c0_9 = arith.constant 0 : index
    %11 = vector.load %arg5[%c0_8, %c0_9] : memref<8x16xf32, #tpu.memory_space<vmem>>, vector<8x16xf32>
    %cst_10 = arith.constant dense<0.000000e+00> : vector<32x16xf32>
    %12 = tpu.matmul %3, %11, %cst_10 {dimension_numbers = #tpu.dot_dimension_numbers<[1], [0], [0], [1], [0, 0, 1, 1], [], []>} : vector<32x8xf32>, vector<8x16xf32>, vector<32x16xf32> -> vector<32x16xf32>
    %c0_11 = arith.constant 0 : index
    %c0_12 = arith.constant 0 : index
    %13 = vector.load %arg6[%c0_11, %c0_12] : memref<1x16xf32, #tpu.memory_space<vmem>>, vector<1x16xf32>
    %14 = vector.broadcast %13 : vector<1x16xf32> to vector<32x16xf32>
    %15 = arith.addf %12, %14 : vector<32x16xf32>
    %cst_13 = arith.constant 0.000000e+00 : f32
    %16 = vector.broadcast %cst_13 : f32 to vector<32x16xf32>
    %17 = arith.maximumf %15, %16 : vector<32x16xf32>
    %c0_14 = arith.constant 0 : index
    %c0_15 = arith.constant 0 : index
    %18 = vector.load %arg7[%c0_14, %c0_15] : memref<16x16xf32, #tpu.memory_space<vmem>>, vector<16x16xf32>
    %cst_16 = arith.constant dense<0.000000e+00> : vector<32x16xf32>
    %19 = tpu.matmul %10, %18, %cst_16 {dimension_numbers = #tpu.dot_dimension_numbers<[1], [0], [0], [1], [0, 0, 1, 1], [], []>} : vector<32x16xf32>, vector<16x16xf32>, vector<32x16xf32> -> vector<32x16xf32>
    %c0_17 = arith.constant 0 : index
    %c0_18 = arith.constant 0 : index
    %20 = vector.load %arg8[%c0_17, %c0_18] : memref<16x16xf32, #tpu.memory_space<vmem>>, vector<16x16xf32>
    %cst_19 = arith.constant dense<0.000000e+00> : vector<32x16xf32>
    %21 = tpu.matmul %17, %20, %cst_19 {dimension_numbers = #tpu.dot_dimension_numbers<[1], [0], [0], [1], [0, 0, 1, 1], [], []>} : vector<32x16xf32>, vector<16x16xf32>, vector<32x16xf32> -> vector<32x16xf32>
    %22 = arith.addf %19, %21 : vector<32x16xf32>
    %c0_20 = arith.constant 0 : index
    %c0_21 = arith.constant 0 : index
    %23 = vector.load %arg9[%c0_20, %c0_21] : memref<1x16xf32, #tpu.memory_space<vmem>>, vector<1x16xf32>
    %24 = vector.broadcast %23 : vector<1x16xf32> to vector<32x16xf32>
    %25 = arith.addf %22, %24 : vector<32x16xf32>
    %cst_22 = arith.constant 0.000000e+00 : f32
    %26 = vector.broadcast %cst_22 : f32 to vector<32x16xf32>
    %27 = arith.maximumf %25, %26 : vector<32x16xf32>
    %28 = arith.truncf %27 : vector<32x16xf32> to vector<32x16xbf16>
    %c0_23 = arith.constant 0 : index
    %c0_24 = arith.constant 0 : index
    %29 = vector.load %arg10[%c0_23, %c0_24] : memref<32x16xbf16, #tpu.memory_space<vmem>>, vector<32x16xbf16>
    tpu.vector_store %arg10[%c0_23, %c0_24], %28 {strides = array<i32>} : memref<32x16xbf16, #tpu.memory_space<vmem>>, vector<32x16xbf16>,
    return
  }
  func.func @transform_0(%arg0: i32) -> (i32, i32) {
    %c0_i32 = arith.constant 0 : i32
    %c0_i32_0 = arith.constant 0 : i32
    return %arg0, %c0_i32 : i32, i32
  }
  func.func @transform_1(%arg0: i32) -> (i32, i32) {
    %c0_i32 = arith.constant 0 : i32
    %c0_i32_0 = arith.constant 0 : i32
    return %arg0, %c0_i32 : i32, i32
  }
  func.func @transform_2(%arg0: i32) -> (i32, i32) {
    %c0_i32 = arith.constant 0 : i32
    %c0_i32_0 = arith.constant 0 : i32
    %c0_i32_1 = arith.constant 0 : i32
    return %c0_i32, %c0_i32_0 : i32, i32
  }
  func.func @transform_3(%arg0: i32) -> (i32, i32) {
    %c0_i32 = arith.constant 0 : i32
    %c0_i32_0 = arith.constant 0 : i32
    %c0_i32_1 = arith.constant 0 : i32
    return %c0_i32, %c0_i32_0 : i32, i32
  }
  func.func @transform_4(%arg0: i32) -> (i32, i32) {
    %c0_i32 = arith.constant 0 : i32
    %c0_i32_0 = arith.constant 0 : i32
    %c0_i32_1 = arith.constant 0 : i32
    return %c0_i32, %c0_i32_0 : i32, i32
  }
  func.func @transform_5(%arg0: i32) -> (i32, i32) {
    %c0_i32 = arith.constant 0 : i32
    %c0_i32_0 = arith.constant 0 : i32
    %c0_i32_1 = arith.constant 0 : i32
    return %c0_i32, %c0_i32_0 : i32, i32
  }
  func.func @transform_6(%arg0: i32) -> (i32, i32) {
    %c0_i32 = arith.constant 0 : i32
    %c0_i32_0 = arith.constant 0 : i32
    %c0_i32_1 = arith.constant 0 : i32
    return %c0_i32, %c0_i32_0 : i32, i32
  }
  func.func @transform_7(%arg0: i32) -> (i32, i32) {
    %c0_i32 = arith.constant 0 : i32
    %c0_i32_0 = arith.constant 0 : i32
    %c0_i32_1 = arith.constant 0 : i32
    return %c0_i32, %c0_i32_0 : i32, i32
  }
  func.func @transform_8(%arg0: i32) -> (i32, i32) {
    %c0_i32 = arith.constant 0 : i32
    %c0_i32_0 = arith.constant 0 : i32
    %c0_i32_1 = arith.constant 0 : i32
    return %c0_i32, %c0_i32_0 : i32, i32
  }
  func.func @transform_9(%arg0: i32) -> (i32, i32) {
    %c0_i32 = arith.constant 0 : i32
    %c0_i32_0 = arith.constant 0 : i32
    return %arg0, %c0_i32 : i32, i32
  }
}

</mosaic_0001>

<bundles_post_ra>
// kernel: tpu_custom_call.1
= control target key start
LH: loop header
LB: loop body
LE: loop exit
PB: predicated region body
PF: predicated region fallthrough
CT: control target
= control target key end

     0   :  { %vm69_vm0 = vcmask 1043456   ;;  %vm56_vm1 = vcmask 31744   ;;  %vm170_vm2 = vcmask 64512   ;;  %vm276_vm3 = vcmask 130048   ;;  %s746_s2 = inlined_call_operand.vmem [shape: f32[4,16], index: 2, kind: input, shape index: {}]   ;;  %s747_s4 = inlined_call_operand.vmem [shape: f32[8,16], index: 4, kind: input, shape index: {}]   ;;  %s748_s0 = inlined_call_operand.vmem [shape: bf16[32,4], index: 0, kind: input, shape index: {}]   ;;  %s749_s1 = inlined_call_operand.vmem [shape: bf16[32,8], index: 1, kind: input, shape index: {}]   ;;  %s750_s7 = inlined_call_operand.vmem [shape: f32[16,16], index: 7, kind: input, shape index: {}]   ;;  %s751_s6 = inlined_call_operand.vmem [shape: f32[16,16], index: 6, kind: input, shape index: {}]   ;;  %s752_s3 = inlined_call_operand.vmem [shape: f32[1,16], index: 3, kind: input, shape index: {}]   ;;  %s753_s5 = inlined_call_operand.vmem [shape: f32[1,16], index: 5, kind: input, shape index: {}]   ;;  %s754_s8 = inlined_call_operand.vmem [shape: f32[1,16], index: 8, kind: input, shape index: {}]   ;;  %s755_s9 = inlined_call_operand.vmem [shape: bf16[32,16], index: 9, kind: output, shape index: {}]  }
   0x1   :  { %v48_v0 = vld [vmem:[%s746_s2] sm:$0xf]  ;;  %v555_v5 = vld [vmem:[%s748_s0 + $0x8] sm:$0xff]   ;;  %vm502_vm4 = vcmask 125952  }
   0x2   :  { %v162_v1 = vld [vmem:[%s747_s4] sm:$0xff]  ;;  %579 = vmatprep.subr.msk.mxu0 %vm69_vm0, %v48_v0  ;;  %v556_v7 = vld [vmem:[%s749_s1 + $0x8] sm:$0xff]   ;;  %v545_v8 = vunpack.c.l.bf16 %v555_v5  ;;  %v546_v17 = vunpack.c.h.bf16 %v555_v5 }
   0x3   :  { %v540_v2 = vld [vmem:[%s748_s0] sm:$0xff]   ;;  %587 = vmatprep.subr.mxu1 %v162_v1  ;;  %580 = vmatpush3.msk.msra.mxu0 %vm69_vm0, %v48_v0  ;;  %v275_v12 = vld [vmem:[%s750_s7 + $0x8] sm:$0xff]  ;;  %v553_v14 = vunpack.c.l.bf16 %v556_v7  ;;  %v554_v19 = vunpack.c.h.bf16 %v556_v7 }
   0x4   :  { %v541_v3 = vunpack.c.l.bf16 %v540_v2  ;;  %v542_v4 = vunpack.c.h.bf16 %v540_v2  ;;  %v548_v6 = vld [vmem:[%s749_s1] sm:$0xff]   ;;  %588 = vmatpush3.msra.mxu1 %v162_v1  ;;  %v273_v16 = vld [vmem:[%s751_s6 + $0x8] sm:$0xff] }
   0x5   :  { %v549_v9 = vunpack.c.l.bf16 %v548_v6  ;;  %v550_v10 = vunpack.c.h.bf16 %v548_v6  ;;  %v274_v11 = vld [vmem:[%s750_s7] sm:$0xff] }
   0x6   :  { %v272_v13 = vld [vmem:[%s751_s6] sm:$0xff]  ;;  %581 = vmatprep.mubr.msk.f32.mxu0 %vm56_vm1, %v541_v3  ;;  %v615_v15 = vpack.c.bf16 %v275_v12, %v274_v11 }
   0x7   :  { %589 = vmatprep.mubr.msk.f32.mxu1 %vm170_vm2, %v549_v9  ;;  %582 = vmatmul.mubr.msk.f32.vlgmr.msra.gmra.mrb[0].mxu0 %vm56_vm1, %v542_v4  ;;  %v619_v18 = vpack.c.bf16 %v273_v16, %v272_v13  ;;  %v511_v20 = vld [vmem:[%s752_s3] ss:$0 sm:$0xff] }
   0x8   :  { %590 = vmatmul.mubr.msk.f32.vlgmr.msra.gmra.mrb[0].mxu1 %vm170_vm2, %v550_v10  ;;  %584 = vmatprep.mubr.msk.f32.mxu0 %vm56_vm1, %v545_v8  ;;  %v517_v21 = vld [vmem:[%s753_s5] ss:$0 sm:$0xff] }
   0x9   :  { %592 = vmatprep.mubr.msk.f32.mxu1 %vm170_vm2, %v553_v14  ;;  %616 = vmatprep.subr.bf16.mxu1 %v615_v15  ;;  %v530_v48 = vld [vmem:[%s754_s8] ss:$0 sm:$0xff] }
   0xa   :  { %620 = vmatprep.subr.bf16.mxu0 %v619_v18  ;;  %618 = vmatpush3.bf16.msra.mxu1 %v615_v15 }
   0xb   :  { %585 = vmatmul.mubr.msk.f32.gmra.mrb[2].mxu0 %vm56_vm1, %v546_v17 }
   0xc   :  { %593 = vmatmul.mubr.msk.f32.gmra.mrb[2].mxu1 %vm170_vm2, %v554_v19  ;;  %622 = vmatpush3.bf16.msra.mxu0 %v619_v18 }
  0xda   :  { %v583_v22 = vpop.f32.mrb[0].mxu0 }
  0xdb   :  { %v145_v23 = vadd.f32 %v583_v22, %v511_v20  ;;  %v591_v24 = vpop.f32.mrb[0].mxu1  ;;  %v139_v25 = vpop.f32.mrb[1].mxu0 }
  0xdc   :  { %v255_v26 = vadd.f32 %v591_v24, %v517_v21  ;;  %v140_v27 = vadd.f32 %v511_v20, %v139_v25  ;;  %v249_v28 = vpop.f32.mrb[1].mxu1 }
  0xdd   :  { %v250_v29 = vadd.f32 %v517_v21, %v249_v28  ;;  %v159_v32 = vmax.f32 %v145_v23, 0.0 }
  0xde   :  { %v158_v30 = vmax.f32 %v140_v27, 0.0  ;;  %v586_v31 = vpop.f32.mrb[2].mxu0  ;;  %v269_v37 = vmax.f32 %v255_v26, 0.0 }
  0xdf   :  { %v268_v33 = vmax.f32 %v250_v29, 0.0  ;;  %v155_v34 = vadd.f32 %v586_v31, %v511_v20  ;;  %v594_v35 = vpop.f32.mrb[2].mxu1  ;;  %v149_v36 = vpop.f32.mrb[3].mxu0 }
  0xe0   :  { %v265_v38 = vadd.f32 %v594_v35, %v517_v21  ;;  %v150_v39 = vadd.f32 %v511_v20, %v149_v36  ;;  %v259_v40 = vpop.f32.mrb[3].mxu1  ;;  %609 = vmatprep.mubr.msk.f32.mxu0 %vm276_vm3, %v158_v30 }
  0xe1   :  { %v260_v41 = vadd.f32 %v517_v21, %v259_v40  ;;  %599 = vmatprep.mubr.msk.f32.mxu1 %vm276_vm3, %v268_v33  ;;  %610 = vmatmul.mubr.msk.f32.vlgmr.msra.gmra.mrb[4].mxu0 %vm276_vm3, %v159_v32  ;;  %v161_v43 = vmax.f32 %v155_v34, 0.0 }
  0xe2   :  { %v160_v42 = vmax.f32 %v150_v39, 0.0  ;;  %600 = vmatmul.mubr.msk.f32.vlgmr.msra.gmra.mrb[4].mxu1 %vm276_vm3, %v269_v37  ;;  %v271_v45 = vmax.f32 %v265_v38, 0.0 }
  0xe3   :  { %v270_v44 = vmax.f32 %v260_v41, 0.0 }
  0xe4   :  { %612 = vmatprep.mubr.msk.f32.mxu0 %vm276_vm3, %v160_v42 }
  0xe5   :  { %602 = vmatprep.mubr.msk.f32.mxu1 %vm276_vm3, %v270_v44  ;;  %613 = vmatmul.mubr.msk.f32.gmra.mrb[6].mxu0 %vm276_vm3, %v161_v43 }
  0xe6   :  { %603 = vmatmul.mubr.msk.f32.gmra.mrb[6].mxu1 %vm276_vm3, %v271_v45 }
 0x1b4   :  { %v611_v46 = vpop.f32.mrb[4].mxu0 }
 0x1b5   :  { %v601_v47 = vpop.f32.mrb[4].mxu1  ;;  %v452_v49 = vpop.f32.mrb[5].mxu0 }
 0x1b6   :  { %v458_v50 = vadd.f32 %v611_v46, %v601_v47  ;;  %v355_v51 = vpop.f32.mrb[5].mxu1 }
 0x1b7   :  { %v453_v52 = vadd.f32 %v452_v49, %v355_v51 }
 0x1b8   :  { %v479_v53 = vadd.f32 %v530_v48, %v458_v50  ;;  %v614_v54 = vpop.f32.mrb[6].mxu0 }
 0x1b9   :  { %v478_v55 = vadd.f32 %v530_v48, %v453_v52  ;;  %v604_v56 = vpop.f32.mrb[6].mxu1  ;;  %v462_v57 = vpop.f32.mrb[7].mxu0 }
 0x1ba   :  { %v483_v58 = vmax.f32 %v479_v53, 0.0  ;;  %v468_v59 = vadd.f32 %v614_v54, %v604_v56  ;;  %v365_v60 = vpop.f32.mrb[7].mxu1 }
 0x1bb   :  { %v482_v61 = vmax.f32 %v478_v55, 0.0  ;;  %v463_v62 = vadd.f32 %v462_v57, %v365_v60 }
 0x1bc   :  { %v536_v63 = vpack.c.bf16 %v483_v58, %v483_v58  ;;  %v481_v0 = vadd.f32 %v530_v48, %v468_v59 }
 0x1bd   :  { %v535_v1 = vpack.c.bf16 %v482_v61, %v482_v61  ;;  %v480_v2 = vadd.f32 %v530_v48, %v463_v62 }
 0x1be   :  { %504 = vst.msk [vmem:[%s755_s9 + $0x4] sm:$0xf] %vm502_vm4, %v536_v63  ;;  %v485_v3 = vmax.f32 %v481_v0, 0.0 }
 0x1bf   :  { %503 = vst.msk [vmem:[%s755_s9] sm:$0xf] %vm502_vm4, %v535_v1  ;;  %v484_v4 = vmax.f32 %v480_v2, 0.0 }
 0x1c0   :  { %v538_v5 = vpack.c.bf16 %v485_v3, %v485_v3 }
 0x1c1   :  { %v537_v6 = vpack.c.bf16 %v484_v4, %v484_v4 }
 0x1c2   :  { %506 = vst.msk [vmem:[%s755_s9 + $0xc] sm:$0xf] %vm502_vm4, %v538_v5 }
 0x1c3   :  { %505 = vst.msk [vmem:[%s755_s9 + $0x8] sm:$0xf] %vm502_vm4, %v537_v6 }

</bundles_post_ra>
